<compile_context>
chip_gen: v7x
topology: tpu7x:2x2x1
jax: 0.10.0
libtpu: 0.0.40
codegen_flags: <defaults>
</compile_context>

<pallas_src>
import functools

import jax
import jax.numpy as jnp
from jax.experimental import pallas as pl
from jax.experimental.pallas import tpu as pltpu

# ----------------------------- problem sizes --------------------------------
B        = 8      # demo batch
OBS_DIM  = 32     # flattened observation size (SB3 Flatten extractor)
HID      = 64     # SB3 default net_arch = [64, 64]
ACT_DIM  = 8      # action size
LANE     = 128    # TPU lane width
HID_PAD  = 128    # hidden padded to a full lane width

W_ROWS   = OBS_DIM + 2 * HID_PAD   # packed weight slab rows: W1 | W2 | W3  (= 288)
B_ROWS   = 8                       # bias slab rows: b1 | b2 | b3 | std | 4 unused


def _round8(x: int) -> int:
    return ((x + 7) // 8) * 8


# ------------------------------ Pallas kernel -------------------------------
def actor_kernel(obs_ref, eps_ref, w_ref, b_ref, act_ref):
    # Static slices of the packed slabs (free: no runtime cost, all 128-lane dense).
    w1 = w_ref[0:OBS_DIM, :]                                   # (32, 128)  bf16
    w2 = w_ref[OBS_DIM:OBS_DIM + HID_PAD, :]                   # (128, 128) bf16, rows 64.. zero
    w3 = w_ref[OBS_DIM + HID_PAD:W_ROWS, :]                    # (128, 128) bf16, rows 64.. zero
    b1 = b_ref[0:1, :]                                         # (1, 128) f32, lanes 64.. zero
    b2 = b_ref[1:2, :]
    b3 = b_ref[2:3, :]                                         # lanes ACT_DIM.. zero
    std = b_ref[3:4, :]                                        # exp(log_std), lanes ACT_DIM.. zero

    # policy_net: two tanh layers (bf16 MXU operands, f32 accumulation / activations)
    obs = obs_ref[...].astype(jnp.bfloat16)
    h1 = jnp.tanh(jnp.dot(obs, w1, preferred_element_type=jnp.float32) + b1)
    h2 = jnp.tanh(jnp.dot(h1.astype(jnp.bfloat16), w2,
                          preferred_element_type=jnp.float32) + b2)
    # action head (lane-dense)
    mean = jnp.dot(h2.astype(jnp.bfloat16), w3,
                   preferred_element_type=jnp.float32) + b3

    # DiagGaussian reparameterized sample: action = mean + std * eps
    # (padded lanes: mean == 0, std == 0 -> action stays 0 there)
    action = mean + std * eps_ref[...]

    # torch.clamp(action, -1, 1)
    act_ref[...] = jnp.clip(action, -1.0, 1.0).astype(act_ref.dtype)


# ------------------------------- wrapper -------------------------------------
@functools.partial(jax.jit, static_argnames=("block_b",))
def onnxable_on_policy_forward(obs, packed_params, rng_key, *, block_b=512):
    """Fused actor MLP + Gaussian sample + clamp.  Returns (B, ACT_DIM) actions."""
    w_slab, b_slab = packed_params
    batch = obs.shape[0]

    b_pad8 = _round8(batch)
    mb = min(block_b, b_pad8)
    # Guarantee >= 2 grid steps when batch allows so the "parallel" batch axis can
    # shard across both v7x TensorCores (harmless on 1-TC v5e/v6e).
    if b_pad8 >= 16 and b_pad8 // mb < 2:
        mb = _round8(pl.cdiv(b_pad8, 2))
    b_pad = pl.cdiv(batch, mb) * mb

    if b_pad != batch:
        obs = jnp.pad(obs, ((0, b_pad - batch), (0, 0)))

    # Standard-normal noise, lane-dense.  Only the first ACT_DIM lanes matter
    # (std == 0 elsewhere); generated once per forward call like SB3's sampler.
    eps = jax.random.normal(rng_key, (b_pad, LANE), jnp.float32)

    out = pl.pallas_call(
        actor_kernel,
        out_shape=jax.ShapeDtypeStruct((b_pad, LANE), jnp.float32),
        grid_spec=pltpu.PrefetchScalarGridSpec(
            num_scalar_prefetch=0,
            grid=(b_pad // mb,),
            in_specs=[
                pl.BlockSpec((mb, OBS_DIM), lambda i: (i, 0)),     # obs tile
                pl.BlockSpec((mb, LANE), lambda i: (i, 0)),        # noise tile
                pl.BlockSpec((W_ROWS, LANE), lambda i: (0, 0)),    # weight slab, VMEM-resident
                pl.BlockSpec((B_ROWS, LANE), lambda i: (0, 0)),    # bias/std slab, VMEM-resident
            ],
            out_specs=pl.BlockSpec((mb, LANE), lambda i: (i, 0)),
        ),
        compiler_params=pltpu.CompilerParams(
            dimension_semantics=("parallel",)),                    # batch axis shards across TCs
    )(obs, eps, w_slab, b_slab)
    return out[:batch, :ACT_DIM]


# ------------------------------ param init / pack ----------------------------
def init_params(key):
    k1, k2, k3 = jax.random.split(key, 3)

    def glorot(k, shape):
        fan_in, fan_out = shape
        lim = jnp.sqrt(6.0 / (fan_in + fan_out))
        return jax.random.uniform(k, shape, jnp.float32, -lim, lim)

    w1 = glorot(k1, (OBS_DIM, HID))
    b1 = jnp.zeros((HID,), jnp.float32)
    w2 = glorot(k2, (HID, HID))
    b2 = jnp.zeros((HID,), jnp.float32)
    w3 = glorot(k3, (HID, ACT_DIM)) * 0.01        # SB3 scales the action head by 0.01
    b3 = jnp.zeros((ACT_DIM,), jnp.float32)
    log_std = jnp.zeros((ACT_DIM,), jnp.float32)  # SB3 init: log_std = 0
    return (w1, b1, w2, b2, w3, b3, log_std)


def pack_params(params):
    """One-time packing: weights -> (288, 128) bf16 slab; biases + std -> (8, 128) f32 slab."""
    w1, b1, w2, b2, w3, b3, log_std = params
    w1p = jnp.pad(w1, ((0, 0), (0, HID_PAD - HID)))                  # (32, 128)
    w2p = jnp.pad(w2, ((0, HID_PAD - HID), (0, HID_PAD - HID)))      # (128, 128)
    w3p = jnp.pad(w3, ((0, HID_PAD - HID), (0, LANE - ACT_DIM)))     # (128, 128)
    w_slab = jnp.concatenate([w1p, w2p, w3p], axis=0).astype(jnp.bfloat16)

    b_slab = jnp.zeros((B_ROWS, LANE), jnp.float32)
    b_slab = b_slab.at[0, :HID].set(b1)
    b_slab = b_slab.at[1, :HID].set(b2)
    b_slab = b_slab.at[2, :ACT_DIM].set(b3)
    b_slab = b_slab.at[3, :ACT_DIM].set(jnp.exp(log_std))            # std precomputed once
    return (w_slab, b_slab)


# TODO(synk): policy.forward also computes value and log_prob internally, but
# OnnxableOnPolicy.forward discards them and returns only the clamped action,
# so only the actor path is implemented here.


if __name__ == "__main__":
    key = jax.random.PRNGKey(0)
    k_obs, k_par, k_eps = jax.random.split(key, 3)

    obs = jax.random.normal(k_obs, (B, OBS_DIM), jnp.float32)
    params = init_params(k_par)
    packed = pack_params(params)

    action = onnxable_on_policy_forward(obs, packed, k_eps)
    action = jax.block_until_ready(action)

    assert action.shape == (B, ACT_DIM)
    assert bool(jnp.all(action <= 1.0)) and bool(jnp.all(action >= -1.0))
    assert bool(jnp.all(jnp.isfinite(action)))
    print("KERNEL_OK")
</pallas_src>

<mosaic_0001>
module attributes {stable_mosaic.version = 11 : i64} {
  func.func @actor_kernel(%arg0: i32, %arg1: memref<8x32xf32, #tpu.memory_space<vmem>>, %arg2: memref<8x128xf32, #tpu.memory_space<vmem>>, %arg3: memref<288x128xbf16, #tpu.memory_space<vmem>>, %arg4: memref<8x128xf32, #tpu.memory_space<vmem>>, %arg5: memref<8x128xf32, #tpu.memory_space<vmem>>) attributes {dimension_semantics = [#tpu.dimension_semantics<parallel>], iteration_bounds = array<i64: 1>, scalar_prefetch = 0 : i64, scratch_operands = 0 : i64, tpu.core_type = #tpu.core_type<tc>, window_params = [{transform_indices = @transform_0, window_bounds = array<i64: 8, 32>}, {transform_indices = @transform_1, window_bounds = array<i64: 8, 128>}, {pipeline_mode = #tpu.pipeline_mode<synchronous>, transform_indices = @transform_2, window_bounds = array<i64: 288, 128>}, {pipeline_mode = #tpu.pipeline_mode<synchronous>, transform_indices = @transform_3, window_bounds = array<i64: 8, 128>}, {transform_indices = @transform_4, window_bounds = array<i64: 8, 128>}]} {
    %c0 = arith.constant 0 : index
    %c0_0 = arith.constant 0 : index
    %0 = vector.load %arg3[%c0, %c0_0] : memref<288x128xbf16, #tpu.memory_space<vmem>>, vector<32x128xbf16>
    %c32 = arith.constant 32 : index
    %c0_1 = arith.constant 0 : index
    %1 = vector.load %arg3[%c32, %c0_1] : memref<288x128xbf16, #tpu.memory_space<vmem>>, vector<128x128xbf16>
    %c160 = arith.constant 160 : index
    %c0_2 = arith.constant 0 : index
    %2 = vector.load %arg3[%c160, %c0_2] : memref<288x128xbf16, #tpu.memory_space<vmem>>, vector<128x128xbf16>
    %c0_3 = arith.constant 0 : index
    %c0_4 = arith.constant 0 : index
    %3 = vector.load %arg4[%c0_3, %c0_4] : memref<8x128xf32, #tpu.memory_space<vmem>>, vector<1x128xf32>
    %c1 = arith.constant 1 : index
    %c0_5 = arith.constant 0 : index
    %4 = vector.load %arg4[%c1, %c0_5] : memref<8x128xf32, #tpu.memory_space<vmem>>, vector<1x128xf32>
    %c2 = arith.constant 2 : index
    %c0_6 = arith.constant 0 : index
    %5 = vector.load %arg4[%c2, %c0_6] : memref<8x128xf32, #tpu.memory_space<vmem>>, vector<1x128xf32>
    %c3 = arith.constant 3 : index
    %c0_7 = arith.constant 0 : index
    %6 = vector.load %arg4[%c3, %c0_7] : memref<8x128xf32, #tpu.memory_space<vmem>>, vector<1x128xf32>
    %c0_8 = arith.constant 0 : index
    %c0_9 = arith.constant 0 : index
    %7 = vector.load %arg1[%c0_8, %c0_9] : memref<8x32xf32, #tpu.memory_space<vmem>>, vector<8x32xf32>
    %8 = arith.truncf %7 : vector<8x32xf32> to vector<8x32xbf16>
    %cst = arith.constant dense<0.000000e+00> : vector<8x128xf32>
    %9 = tpu.matmul %8, %0, %cst {dimension_numbers = #tpu.dot_dimension_numbers<[1], [0], [0], [1], [0, 0, 1, 1], [], []>} : vector<8x32xbf16>, vector<32x128xbf16>, vector<8x128xf32> -> vector<8x128xf32>
    %10 = vector.broadcast %3 : vector<1x128xf32> to vector<8x128xf32>
    %11 = arith.addf %9, %10 : vector<8x128xf32>
    %12 = math.tanh %11 : vector<8x128xf32>
    %13 = arith.truncf %12 : vector<8x128xf32> to vector<8x128xbf16>
    %cst_10 = arith.constant dense<0.000000e+00> : vector<8x128xf32>
    %14 = tpu.matmul %13, %1, %cst_10 {dimension_numbers = #tpu.dot_dimension_numbers<[1], [0], [0], [1], [0, 0, 1, 1], [], []>} : vector<8x128xbf16>, vector<128x128xbf16>, vector<8x128xf32> -> vector<8x128xf32>
    %15 = vector.broadcast %4 : vector<1x128xf32> to vector<8x128xf32>
    %16 = arith.addf %14, %15 : vector<8x128xf32>
    %17 = math.tanh %16 : vector<8x128xf32>
    %18 = arith.truncf %17 : vector<8x128xf32> to vector<8x128xbf16>
    %cst_11 = arith.constant dense<0.000000e+00> : vector<8x128xf32>
    %19 = tpu.matmul %18, %2, %cst_11 {dimension_numbers = #tpu.dot_dimension_numbers<[1], [0], [0], [1], [0, 0, 1, 1], [], []>} : vector<8x128xbf16>, vector<128x128xbf16>, vector<8x128xf32> -> vector<8x128xf32>
    %20 = vector.broadcast %5 : vector<1x128xf32> to vector<8x128xf32>
    %21 = arith.addf %19, %20 : vector<8x128xf32>
    %c0_12 = arith.constant 0 : index
    %c0_13 = arith.constant 0 : index
    %22 = vector.load %arg2[%c0_12, %c0_13] : memref<8x128xf32, #tpu.memory_space<vmem>>, vector<8x128xf32>
    %23 = vector.broadcast %6 : vector<1x128xf32> to vector<8x128xf32>
    %24 = arith.mulf %23, %22 : vector<8x128xf32>
    %25 = arith.addf %21, %24 : vector<8x128xf32>
    %cst_14 = arith.constant -1.000000e+00 : f32
    %cst_15 = arith.constant 1.000000e+00 : f32
    %26 = vector.broadcast %cst_14 : f32 to vector<8x128xf32>
    %27 = arith.maximumf %26, %25 : vector<8x128xf32>
    %28 = vector.broadcast %cst_15 : f32 to vector<8x128xf32>
    %29 = arith.minimumf %28, %27 : vector<8x128xf32>
    %c0_16 = arith.constant 0 : index
    %c0_17 = arith.constant 0 : index
    %30 = vector.load %arg5[%c0_16, %c0_17] : memref<8x128xf32, #tpu.memory_space<vmem>>, vector<8x128xf32>
    tpu.vector_store %arg5[%c0_16, %c0_17], %29 {strides = array<i32>} : memref<8x128xf32, #tpu.memory_space<vmem>>, vector<8x128xf32>,
    return
  }
  func.func @transform_0(%arg0: i32) -> (i32, i32) {
    %c0_i32 = arith.constant 0 : i32
    %c0_i32_0 = arith.constant 0 : i32
    return %arg0, %c0_i32 : i32, i32
  }
  func.func @transform_1(%arg0: i32) -> (i32, i32) {
    %c0_i32 = arith.constant 0 : i32
    %c0_i32_0 = arith.constant 0 : i32
    return %arg0, %c0_i32 : i32, i32
  }
  func.func @transform_2(%arg0: i32) -> (i32, i32) {
    %c0_i32 = arith.constant 0 : i32
    %c0_i32_0 = arith.constant 0 : i32
    %c0_i32_1 = arith.constant 0 : i32
    return %c0_i32, %c0_i32_0 : i32, i32
  }
  func.func @transform_3(%arg0: i32) -> (i32, i32) {
    %c0_i32 = arith.constant 0 : i32
    %c0_i32_0 = arith.constant 0 : i32
    %c0_i32_1 = arith.constant 0 : i32
    return %c0_i32, %c0_i32_0 : i32, i32
  }
  func.func @transform_4(%arg0: i32) -> (i32, i32) {
    %c0_i32 = arith.constant 0 : i32
    %c0_i32_0 = arith.constant 0 : i32
    return %arg0, %c0_i32 : i32, i32
  }
}

</mosaic_0001>

<bundles_post_ra>
// kernel: onnxable_on_policy_forward.1
= control target key start
LH: loop header
LB: loop body
LE: loop exit
PB: predicated region body
PF: predicated region fallthrough
CT: control target
= control target key end

     0   :  { %9 = vsyncpa [#allocation3], 0  ;;  %s614_s0 = inlined_call_operand.vmem [shape: f32[8,32], index: 0, kind: input, shape index: {}]   ;;  %s615_s1 = inlined_call_operand.vmem [shape: f32[8,128], index: 1, kind: input, shape index: {}]   ;;  %s616_s2 = inlined_call_operand.hbm [shape: bf16[288,128], index: 2, kind: input, shape index: {}]   ;;  %s617_s3 = inlined_call_operand.vmem [shape: f32[8,128], index: 3, kind: input, shape index: {}]   ;;  %s618_s4 = inlined_call_operand.hbm [shape: f32[8,128], index: 4, kind: output, shape index: {}]  }
   0x1   :  { %10 = vsyncpa [#allocation4], 0  ;;  %s517_s15 = smov [#allocation2]   ;;  %s469_s19 = scalar_lea.hbm %s616_s2, 2304 }
   0x2   :  { %s20_s16 = sshll.u32 %s517_s15, 4  ;;  %p470_p0 = scmp.ne.s32.totalorder %s616_s2, %s469_s19  ;;  %s21_s16 = int_to_ptr.vmem [resolvable:$true] %s20_s16 }
   0x3   :  { %p473_p1 = scmp.lt.u32.totalorder %s469_s19, %s616_s2 }
   0x5   :  { %p475_p2 = pnand %p473_p1, %p470_p0 }
   0x7   :  { %478 = shalt.err (!%p475_p2)
}
   0x8   :  { %s479_s24 = scalar_lea.vmem %s21_s16, 2304  ;;  %p484_p4 = scmp.lt.s32.totalorder %s21_s16, %s21_s16 }
   0x9   :  { %p480_p3 = scmp.ne.s32.totalorder %s21_s16, %s479_s24  ;;  %p485_p5 = scmp.lt.s32.totalorder %s479_s24, %s479_s24 }
   0xb   :  { %p486_p6 = por %p485_p5, %p484_p4 }
   0xd   :  { %p487_p7 = pnand %p486_p6, %p480_p3 }
   0xf   :  { %490 = shalt.err (!%p487_p7)
}
  0x10   :  { %s518_s25 = smov 64   ;;  %s519_s26 = smov 4  }
  0x11   :  { %26 = dma.hbm_to_vmem [thread:$0]  %s616_s2, 2304, %s21_s16, [#allocation3], %s518_s25, %s518_s25, %s519_s26  }
  0x12   :  { %513 = dma.done.wait [#allocation3], 2304  }
  0x13   :  { %514 = vsyncadd [#allocation3], 4294964992  ;;  %v520_v0 = vmov 0.0   ;;  %vm521_vm0 = vmmov 0   ;;  %v447_v1 = vld [vmem:[#allocation2] sm:$0xff]   ;;  %v448_v2 = vld [vmem:[#allocation2 + $0x8] sm:$0xff]  }
  0x14   :  { %393 = vmatprep.subr.bf16.mxu0 %v520_v0  ;;  %397 = vmatprep.mubr.msk.bf16.mxu0 %vm521_vm0, %v520_v0  ;;  %v73_v3 = vld [vmem:[%s614_s0] sm:$0xff]  ;;  %v449_v4 = vld [vmem:[#allocation2 + $0x10] sm:$0xff]   ;;  %v450_v6 = vld [vmem:[#allocation2 + $0x18] sm:$0xff]   ;;  %vm91_vm1 = vcmask 261120   ;;  %s522_s13 = smov [#allocation5]  }
  0x15   :  { %401 = vmatprep.subr.bf16.mxu1 %v520_v0  ;;  %417 = vmatprep.mubr.msk.bf16.mxu1 %vm521_vm0, %v520_v0  ;;  %v74_v5 = vpack.c.bf16 %v73_v3, %v73_v3  ;;  %v451_v7 = vld [vmem:[#allocation2 + $0x20] sm:$0xff]   ;;  %v452_v8 = vld [vmem:[#allocation2 + $0x28] sm:$0xff]   ;;  %v453_v9 = vld [vmem:[#allocation2 + $0x30] sm:$0xff]   ;;  %s339_s14 = sshll.u32 %s522_s13, 4  ;;  %s340_s14 = int_to_ptr.vmem [resolvable:$true] %s339_s14 }
  0x16   :  { %394 = vmatpush3.bf16.msra.mxu0 %v447_v1  ;;  %402 = vmatpush3.bf16.msra.mxu1 %v449_v4  ;;  %v454_v10 = vld [vmem:[#allocation2 + $0x38] sm:$0xff]   ;;  %v455_v11 = vld [vmem:[#allocation2 + $0x40] sm:$0xff]   ;;  %v456_v12 = vld [vmem:[#allocation2 + $0x48] sm:$0xff]   ;;  %s491_s15 = scalar_lea.vmem %s340_s14, 128  ;;  %p496_p9 = scmp.lt.s32.totalorder %s340_s14, %s340_s14 }
  0x17   :  { %395 = vmatprep.subr.bf16.mxu0 %v520_v0  ;;  %403 = vmatprep.subr.bf16.mxu1 %v520_v0  ;;  %v457_v13 = vld [vmem:[#allocation2 + $0x50] sm:$0xff]   ;;  %v458_v14 = vld [vmem:[#allocation2 + $0x58] sm:$0xff]   ;;  %v459_v15 = vld [vmem:[#allocation2 + $0x60] sm:$0xff]   ;;  %p492_p8 = scmp.ne.s32.totalorder %s340_s14, %s491_s15  ;;  %p497_p10 = scmp.lt.s32.totalorder %s491_s15, %s491_s15 }
  0x18   :  { %v460_v16 = vld [vmem:[#allocation2 + $0x68] sm:$0xff]   ;;  %v348_v17 = vld [vmem:[%s617_s3] ss:$0 sm:$0xff]  ;;  %v461_v25 = vld [vmem:[#allocation2 + $0x70] sm:$0xff]  }
  0x19   :  { %v462_v26 = vld [vmem:[#allocation2 + $0x78] sm:$0xff]   ;;  %v463_v27 = vld [vmem:[#allocation2 + $0x80] sm:$0xff]   ;;  %v464_v28 = vld [vmem:[#allocation2 + $0x88] sm:$0xff]   ;;  %p498_p11 = por %p497_p10, %p496_p9 }
  0x1a   :  { %396 = vmatpush3.bf16.msra.mxu0 %v448_v2  ;;  %404 = vmatpush3.bf16.msra.mxu1 %v450_v6  ;;  %v352_v29 = vld [vmem:[%s617_s3 + $0x1] ss:$0 sm:$0xff]  ;;  %v370_v37 = vld [vmem:[%s617_s3 + $0x3] ss:$0 sm:$0xff]  ;;  %v361_v39 = vld [vmem:[%s617_s3 + $0x2] ss:$0 sm:$0xff] }
  0x1b   :  { %421 = vmatprep.subr.bf16.mxu0 %v520_v0  ;;  %405 = vmatprep.subr.bf16.mxu1 %v520_v0  ;;  %v323_v38 = vld [vmem:[%s615_s1] sm:$0xff]  ;;  %p499_p12 = pnand %p498_p11, %p492_p8 }
  0x1c   :  { %v328_v40 = vmul.f32 %v370_v37, %v323_v38 }
  0x1d   :  { %398 = vmatmul.mubr.msk.bf16.vlgmr.msra.gmra.mrb[0].mxu0 %vm91_vm1, %v74_v5 }
  0x1e   :  { %437 = vmatprep.mubr.msk.bf16.mxu0 %vm521_vm0, %v520_v0  ;;  %406 = vmatpush3.bf16.msra.mxu1 %v451_v7 }
  0x1f   :  { %407 = vmatprep.subr.bf16.mxu1 %v520_v0  ;;  %422 = vmatpush3.bf16.msra.mxu0 %v457_v13 }
  0x20   :  { %423 = vmatprep.subr.bf16.mxu0 %v520_v0 }
  0x22   :  { %408 = vmatpush3.bf16.msra.mxu1 %v452_v8 }
  0x23   :  { %409 = vmatprep.subr.bf16.mxu1 %v520_v0  ;;  %424 = vmatpush3.bf16.msra.mxu0 %v458_v14 }
  0x24   :  { %425 = vmatprep.subr.bf16.mxu0 %v520_v0 }
  0x26   :  { %410 = vmatpush3.bf16.msra.mxu1 %v453_v9 }
  0x27   :  { %411 = vmatprep.subr.bf16.mxu1 %v520_v0  ;;  %426 = vmatpush3.bf16.msra.mxu0 %v459_v15 }
  0x28   :  { %427 = vmatprep.subr.bf16.mxu0 %v520_v0 }
  0x2a   :  { %412 = vmatpush3.bf16.msra.mxu1 %v454_v10 }
  0x2b   :  { %413 = vmatprep.subr.bf16.mxu1 %v520_v0  ;;  %428 = vmatpush3.bf16.msra.mxu0 %v460_v16 }
  0x2c   :  { %429 = vmatprep.subr.bf16.mxu0 %v520_v0 }
  0x2e   :  { %414 = vmatpush3.bf16.msra.mxu1 %v455_v11 }
  0x2f   :  { %415 = vmatprep.subr.bf16.mxu1 %v520_v0  ;;  %430 = vmatpush3.bf16.msra.mxu0 %v461_v25 }
  0x30   :  { %431 = vmatprep.subr.bf16.mxu0 %v520_v0 }
  0x32   :  { %416 = vmatpush3.bf16.msra.mxu1 %v456_v12 }
  0x33   :  { %432 = vmatpush3.bf16.msra.mxu0 %v462_v26 }
  0x34   :  { %433 = vmatprep.subr.bf16.mxu0 %v520_v0 }
  0x37   :  { %434 = vmatpush3.bf16.msra.mxu0 %v463_v27 }
  0x38   :  { %435 = vmatprep.subr.bf16.mxu0 %v520_v0 }
  0x3b   :  { %436 = vmatpush3.bf16.msra.mxu0 %v464_v28 }
  0xf0   :  { %v129_v18 = vpop.f32.mrb[0].mxu0 }
  0xf1   :  { %v130_v19 = vadd.f32 %v348_v17, %v129_v18  ;;  %v399_v20 = vpop.f32.mrb[1].mxu0 }
  0xf2   :  { %v132_v21 = vpop.f32.mrb[2].mxu0 }
  0xf3   :  { %465 = vtanh.f32 %v130_v19  ;;  %v400_v22 = vpop.f32.mrb[3].mxu0 }
  0xfd   :  { %v466_v23 = vpop.eup %465 }
  0xfe   :  { %v136_v24 = vpack.c.bf16 %v466_v23, %v466_v23 }
 0x100   :  { %418 = vmatmul.mubr.bf16.vlgmr.msra.gmra.mrb[0].mxu1 %v136_v24 }
 0x1d3   :  { %v223_v30 = vpop.f32.mrb[0].mxu1 }
 0x1d4   :  { %v224_v31 = vadd.f32 %v352_v29, %v223_v30  ;;  %v419_v32 = vpop.f32.mrb[1].mxu1 }
 0x1d5   :  { %v226_v33 = vpop.f32.mrb[2].mxu1 }
 0x1d6   :  { %467 = vtanh.f32 %v224_v31  ;;  %v420_v34 = vpop.f32.mrb[3].mxu1 }
 0x1e0   :  { %v468_v35 = vpop.eup %467 }
 0x1e1   :  { %v230_v36 = vpack.c.bf16 %v468_v35, %v468_v35 }
 0x1e3   :  { %438 = vmatmul.mubr.bf16.vlgmr.msra.gmra.mrb[4].mxu0 %v230_v36 }
 0x2b6   :  { %v317_v41 = vpop.f32.mrb[4].mxu0 }
 0x2b7   :  { %v318_v42 = vadd.f32 %v361_v39, %v317_v41  ;;  %v439_v43 = vpop.f32.mrb[5].mxu0 }
 0x2b8   :  { %v320_v44 = vpop.f32.mrb[6].mxu0 }
 0x2b9   :  { %v329_v45 = vadd.f32 %v328_v40, %v318_v42  ;;  %v440_v46 = vpop.f32.mrb[7].mxu0 }
 0x2bb   :  { %v371_v47 = vclamps-f32 %v329_v45, 1.0 }
 0x2bd   :  { %332 = vst [vmem:[#allocation5] sm:$0xff] %v371_v47 }
 0x2be   :  { %502 = shalt.err (!%p499_p12)
}
 0x2bf   :  { %s503_s16 = scalar_lea.hbm %s618_s4, 128 }
 0x2c0   :  { %p504_p13 = scmp.ne.s32.totalorder %s618_s4, %s503_s16  ;;  %p507_p0 = scmp.lt.u32.totalorder %s503_s16, %s618_s4 }
 0x2c2   :  { %p509_p1 = pnand %p507_p0, %p504_p13 }
 0x2c4   :  { %512 = shalt.err (!%p509_p1)
}
 0x2c5   :  { %342 = dma.vmem_to_hbm [thread:$0]  %s340_s14, 128, %s618_s4, [#allocation4]  }
 0x2c6   :  { %515 = dma.done.wait [#allocation4], 128  }
 0x2c7   :  { %516 = vsyncadd [#allocation4], 4294967168 }
 0x2c8   :  { %346 = vsyncpa [#allocation3], 1 }
 0x2c9   :  { %347 = vsyncpa [#allocation4], 1 }

</bundles_post_ra>
